<compile_context>
chip_gen: v5e
topology: v5e:2x2
jax: 0.10.0
libtpu: 0.0.40
codegen_flags: <defaults>
</compile_context>

<pallas_src>
import functools
import math

import jax
import jax.numpy as jnp
from jax.experimental import pallas as pl
from jax.experimental.pallas import tpu as pltpu

_LANE = 128
_VMEM_TILE_BUDGET = 16 * 1024 * 1024   # target bytes for double-buffered in+out tiles
_VMEM_LIMIT_BYTES = 32 * 1024 * 1024   # scoped VMEM limit: safe on v5e/v6e/v7x


def _min_sublane(dtype):
    itemsize = jnp.dtype(dtype).itemsize
    return {4: 8, 2: 16, 1: 32}.get(itemsize, 8)


def _round_up(x, m):
    return ((x + m - 1) // m) * m


def _concat_kernel(*refs, groups, offsets, sizes, row_bcast, rows, out_dtype):
    """refs = (*input_refs, out_ref).

    Inputs are grouped so each group's column window starts and ends on a
    128-lane boundary whenever possible -> one wide, lane-dense store per
    group.  Dtype promotion happens here on the loaded tile (cheap VPU cast).
    """
    out_ref = refs[-1]
    in_refs = refs[:-1]
    for grp in groups:
        parts = []
        for idx in grp:
            x = in_refs[idx][...].astype(out_dtype)
            if row_bcast[idx]:
                # (1, D_i) tile replicated across the row tile (VPU only; the
                # expanded tensor never touches HBM).
                x = jnp.broadcast_to(x, (rows, sizes[idx]))
            parts.append(x)
        seg = parts[0] if len(parts) == 1 else jnp.concatenate(parts, axis=-1)
        off = offsets[grp[0]]
        width = sum(sizes[i] for i in grp)
        out_ref[:, off:off + width] = seg


def _pallas_concat(entries, lead, R, out_dtype):
    """entries: list of (flat_array, kind, R_i); kind in {'full','row1','periodic'}."""
    sizes = [int(e[0].shape[-1]) for e in entries]
    offsets = []
    acc = 0
    for s in sizes:
        offsets.append(acc)
        acc += s
    d_total = acc

    # Sublane minimum must respect every dtype that shows up in VMEM tiles.
    sub = _min_sublane(out_dtype)
    for arr, _, _ in entries:
        sub = max(sub, _min_sublane(arr.dtype))

    # Row tile: as large as the VMEM budget allows.  Double-buffered input
    # tiles + double-buffered output tile (row1 inputs are a single row, so
    # they are negligible and skipped here).
    in_bytes_per_row = 0
    for (arr, kind, _), d in zip(entries, sizes):
        if kind != "row1":
            in_bytes_per_row += d * jnp.dtype(arr.dtype).itemsize
    out_bytes_per_row = d_total * jnp.dtype(out_dtype).itemsize
    per_row = 2 * (in_bytes_per_row + out_bytes_per_row)

    row_tile = _VMEM_TILE_BUDGET // max(1, per_row)
    row_tile = max(sub, (row_tile // sub) * sub)
    row_tile = min(row_tile, _round_up(R, sub))
    # TODO(synk): add a column-group grid axis when d_total is too wide for
    # VMEM even at the minimum row tile.

    # Periodic (leading-prefix broadcast) inputs: the row tile must divide the
    # input's row period so every output tile maps to one contiguous input tile.
    entries = list(entries)
    demoted = []
    for i, (arr, kind, R_i) in enumerate(entries):
        if kind == "periodic":
            if R_i % sub == 0:
                row_tile = math.gcd(row_tile, R_i)
            else:
                demoted.append(i)
    for i in demoted:
        arr, _, R_i = entries[i]
        # TODO(synk): handle periods not aligned to the sublane tile without
        # materializing the repeat in HBM.
        entries[i] = (jnp.tile(arr, (R // R_i, 1)), "full", R)

    if row_tile >= R:
        row_tile = R                      # single full-extent block
    grid = pl.cdiv(R, row_tile)           # ragged last block handled by Pallas

    # Lane-dense store groups: cut at 128-lane boundaries of the output, so
    # every group's store starts lane-aligned and (except possibly the last)
    # has a width that is a multiple of 128 -> unmasked vst.
    groups = []
    cur = []
    for i, (off, sz) in enumerate(zip(offsets, sizes)):
        cur.append(i)
        if (off + sz) % _LANE == 0:
            groups.append(tuple(cur))
            cur = []
    if cur:
        groups.append(tuple(cur))
    groups = tuple(groups)

    in_specs = []
    for (arr, kind, R_i), d in zip(entries, sizes):
        if kind == "full":
            in_specs.append(pl.BlockSpec((row_tile, d), lambda r: (r, 0)))
        elif kind == "row1":
            in_specs.append(pl.BlockSpec((1, d), lambda r: (0, 0)))
        else:  # periodic leading-prefix broadcast
            period = R_i // row_tile
            in_specs.append(
                pl.BlockSpec((row_tile, d), lambda r, p=period: (r % p, 0)))
    out_spec = pl.BlockSpec((row_tile, d_total), lambda r: (r, 0))

    kernel = functools.partial(
        _concat_kernel,
        groups=groups,
        offsets=tuple(offsets),
        sizes=tuple(sizes),
        row_bcast=tuple(e[1] == "row1" for e in entries),
        rows=row_tile,
        out_dtype=out_dtype,
    )

    out_flat = pl.pallas_call(
        kernel,
        out_shape=jax.ShapeDtypeStruct((R, d_total), out_dtype),
        grid_spec=pltpu.PrefetchScalarGridSpec(
            num_scalar_prefetch=0,
            grid=(grid,),
            in_specs=in_specs,
            out_specs=out_spec,
        ),
        compiler_params=pltpu.CompilerParams(
            dimension_semantics=("parallel",),
            vmem_limit_bytes=_VMEM_LIMIT_BYTES,
        ),
    )(*[e[0] for e in entries])
    return out_flat.reshape(tuple(lead) + (d_total,))


def concat_module(*input_args, allow_broadcast=False):
    """JAX/Pallas equivalent of ConcatModule.forward."""
    if len(input_args) == 1:
        input_args = input_args[0]
    # single-tensor passthrough (torch.is_tensor branch)
    if isinstance(input_args, jax.Array):
        return input_args

    tensors = list(input_args)
    out_dtype = jnp.result_type(*tensors)

    if allow_broadcast:
        lead = jnp.broadcast_shapes(*[t.shape[:-1] for t in tensors])
    else:
        lead = tuple(tensors[0].shape[:-1])
    nlead = len(lead)

    R = 1
    for d in lead:
        R *= int(d)

    entries = []
    for t in tensors:
        d = int(t.shape[-1])
        tl = tuple(t.shape[:-1])
        tl = (1,) * (nlead - len(tl)) + tl            # right-align, pad with 1s
        if (not allow_broadcast) or tl == lead:
            entries.append((t.reshape(R, d), "full", R))
        elif all(s == 1 for s in tl):
            # fully broadcast along the rows: keep the single row, replicate
            # in-kernel (no HBM materialization).
            entries.append((t.reshape(1, d), "row1", 1))
        else:
            k = 0
            while k < nlead and tl[k] == 1:
                k += 1
            if tl[k:] == tuple(lead[k:]):
                # broadcast only over a leading prefix -> periodic row mapping,
                # expressed through the BlockSpec index_map (no HBM copy).
                R_i = 1
                for s in tl[k:]:
                    R_i *= int(s)
                entries.append((t.reshape(R_i, d), "periodic", R_i))
            else:
                # TODO(synk): express interior-dim broadcasts via index_map too;
                # fall back to materializing this rarer pattern.
                tb = jnp.broadcast_to(t, tuple(lead) + (d,))
                entries.append((tb.reshape(R, d), "full", R))

    return _pallas_concat(entries, lead, R, out_dtype)


if __name__ == "__main__":
    key = jax.random.PRNGKey(0)
    k1, k2, k3, k4 = jax.random.split(key, 4)

    # basic concat: batch=2, seq=16, hidden splits 32/64/32 -> concat dim 128
    x1 = jax.random.normal(k1, (2, 16, 32), dtype=jnp.float32)
    x2 = jax.random.normal(k2, (2, 16, 64), dtype=jnp.float32)
    x3 = jax.random.normal(k3, (2, 16, 32), dtype=jnp.float32)
    out = jax.block_until_ready(concat_module(x1, x2, x3))
    ref = jnp.concatenate([x1, x2, x3], axis=-1)
    assert out.shape == (2, 16, 128), out.shape
    assert out.dtype == jnp.float32
    assert bool(jnp.allclose(out, ref)), "mismatch vs reference concat"

    # single-tensor passthrough branch
    same = jax.block_until_ready(concat_module(x1))
    assert bool(jnp.allclose(same, x1))

    # mixed dtype (in-kernel promotion): bf16 + f32 -> f32
    xb = x2.astype(jnp.bfloat16)
    outm = jax.block_until_ready(concat_module(x1, xb))
    refm = jnp.concatenate([x1, xb.astype(jnp.float32)], axis=-1)
    assert outm.dtype == jnp.float32
    assert bool(jnp.allclose(outm, refm))

    # allow_broadcast: leading-prefix broadcast handled via periodic index_map
    y1 = jax.random.normal(k1, (2, 16, 32), dtype=jnp.float32)
    y2 = jax.random.normal(k2, (1, 16, 16), dtype=jnp.float32)
    outb = jax.block_until_ready(concat_module(y1, y2, allow_broadcast=True))
    refb = jnp.concatenate([y1, jnp.broadcast_to(y2, (2, 16, 16))], axis=-1)
    assert bool(jnp.allclose(outb, refb))

    # allow_broadcast: rank-deficient input (single VMEM row, replicated in-kernel)
    z = jax.random.normal(k4, (16,), dtype=jnp.float32)
    outc = jax.block_until_ready(concat_module(y1, z, allow_broadcast=True))
    refc = jnp.concatenate([y1, jnp.broadcast_to(z, (2, 16, 16))], axis=-1)
    assert bool(jnp.allclose(outc, refc))

    print("KERNEL_OK")
</pallas_src>

<mosaic_0001>
module attributes {stable_mosaic.version = 11 : i64} {
  func.func @_concat_kernel(%arg0: i32, %arg1: memref<32x32xf32, #tpu.memory_space<vmem>>, %arg2: memref<32x64xf32, #tpu.memory_space<vmem>>, %arg3: memref<32x32xf32, #tpu.memory_space<vmem>>, %arg4: memref<32x128xf32, #tpu.memory_space<vmem>>) attributes {dimension_semantics = [#tpu.dimension_semantics<parallel>], iteration_bounds = array<i64: 1>, scalar_prefetch = 0 : i64, scratch_operands = 0 : i64, tpu.core_type = #tpu.core_type<tc>, window_params = [{transform_indices = @transform_0, window_bounds = array<i64: 32, 32>}, {transform_indices = @transform_1, window_bounds = array<i64: 32, 64>}, {transform_indices = @transform_2, window_bounds = array<i64: 32, 32>}, {transform_indices = @transform_3, window_bounds = array<i64: 32, 128>}]} {
    %c0 = arith.constant 0 : index
    %c0_0 = arith.constant 0 : index
    %0 = vector.load %arg1[%c0, %c0_0] : memref<32x32xf32, #tpu.memory_space<vmem>>, vector<32x32xf32>
    %c0_1 = arith.constant 0 : index
    %c0_2 = arith.constant 0 : index
    %1 = vector.load %arg2[%c0_1, %c0_2] : memref<32x64xf32, #tpu.memory_space<vmem>>, vector<32x64xf32>
    %c0_3 = arith.constant 0 : index
    %c0_4 = arith.constant 0 : index
    %2 = vector.load %arg3[%c0_3, %c0_4] : memref<32x32xf32, #tpu.memory_space<vmem>>, vector<32x32xf32>
    %3 = tpu.concatenate %0, %1, %2 in 1 : vector<32x32xf32>, vector<32x64xf32>, vector<32x32xf32> -> vector<32x128xf32>
    %c0_5 = arith.constant 0 : index
    %c0_6 = arith.constant 0 : index
    %4 = vector.load %arg4[%c0_5, %c0_6] : memref<32x128xf32, #tpu.memory_space<vmem>>, vector<32x128xf32>
    tpu.vector_store %arg4[%c0_5, %c0_6], %3 {strides = array<i32>} : memref<32x128xf32, #tpu.memory_space<vmem>>, vector<32x128xf32>,
    return
  }
  func.func @transform_0(%arg0: i32) -> (i32, i32) {
    %c0_i32 = arith.constant 0 : i32
    %c0_i32_0 = arith.constant 0 : i32
    return %arg0, %c0_i32 : i32, i32
  }
  func.func @transform_1(%arg0: i32) -> (i32, i32) {
    %c0_i32 = arith.constant 0 : i32
    %c0_i32_0 = arith.constant 0 : i32
    return %arg0, %c0_i32 : i32, i32
  }
  func.func @transform_2(%arg0: i32) -> (i32, i32) {
    %c0_i32 = arith.constant 0 : i32
    %c0_i32_0 = arith.constant 0 : i32
    return %arg0, %c0_i32 : i32, i32
  }
  func.func @transform_3(%arg0: i32) -> (i32, i32) {
    %c0_i32 = arith.constant 0 : i32
    %c0_i32_0 = arith.constant 0 : i32
    return %arg0, %c0_i32 : i32, i32
  }
}

</mosaic_0001>

<bundles_post_ra>
// kernel: tpu_custom_call.1
= control target key start
LH: loop header
LB: loop body
LE: loop exit
PB: predicated region body
PF: predicated region fallthrough
CT: control target
= control target key end

     0   :  { %8 = vsyncpa [#allocation3], 0  ;;  %s310_s0 = inlined_call_operand.hbm [shape: f32[32,32], index: 0, kind: input, shape index: {}]   ;;  %s311_s1 = inlined_call_operand.hbm [shape: f32[32,64], index: 1, kind: input, shape index: {}]   ;;  %s312_s2 = inlined_call_operand.hbm [shape: f32[32,32], index: 2, kind: input, shape index: {}]   ;;  %s313_s3 = inlined_call_operand.hbm [shape: f32[32,128], index: 3, kind: output, shape index: {}]  }
   0x1   :  { %9 = vsyncpa [#allocation6], 0 }
   0x2   :  { %10 = vsyncpa [#allocation4], 0  ;;  %s28_s14 = sshll.u32 %s311_s1, 4  ;;  %s250_s15 = smov [#allocation5]   ;;  %s29_s14 = int_to_ptr.hbm [resolvable:$true] %s28_s14 }
   0x3   :  { %s30_s16 = sshll.u32 %s250_s15, 4  ;;  %s15_s19 = sshll.u32 %s310_s0, 4  ;;  %s31_s16 = int_to_ptr.vmem [resolvable:$true] %s30_s16  ;;  %s16_s19 = int_to_ptr.hbm [resolvable:$true] %s15_s19 }
   0x4   :  { %s251_s20 = smov 128   ;;  %s252_s21 = smov 8  }
   0x5   :  { %36 = dma.hbm_to_vmem [thread:$0]  %s29_s14, 512, %s31_s16, [#allocation6], %s251_s20, %s251_s20, %s252_s21  }
   0x6   :  { %s253_s22 = smov [#allocation2]   ;;  %s41_s1 = sshll.u32 %s312_s2, 4  ;;  %s42_s1 = int_to_ptr.hbm [resolvable:$true] %s41_s1 }
   0x7   :  { %s17_s23 = sshll.u32 %s253_s22, 4  ;;  %s254_s0 = smov [#allocation7]   ;;  %s18_s23 = int_to_ptr.vmem [resolvable:$true] %s17_s23 }
   0x8   :  { %23 = dma.hbm_to_vmem [thread:$0]  %s16_s19, 512, %s18_s23, [#allocation3], %s251_s20, %s251_s20, %s252_s21  }
   0x9   :  { %s43_s26 = sshll.u32 %s254_s0, 4  ;;  %s44_s26 = int_to_ptr.vmem [resolvable:$true] %s43_s26 }
   0xa   :  { %49 = dma.hbm_to_vmem [thread:$0]  %s42_s1, 512, %s44_s26, [#allocation6], %s251_s20, %s251_s20, %s252_s21  }
   0xb   :  { %244 = dma.done.wait [#allocation3], 512  }
   0xc   :  { %245 = vsyncadd [#allocation3], 4294966784 }
   0xd   :  { %246 = dma.done.wait [#allocation6], 1024  }
   0xe   :  { %247 = vsyncadd [#allocation6], 4294966272  ;;  %v68_v0 = vld [vmem:[#allocation5 + $0x10] sm:$0xff]  ;;  %v66_v1 = vld [vmem:[#allocation5] sm:$0xff]  ;;  %s255_s2 = smov 32   ;;  %s256_s27 = smov 96  }
   0xf   :  { %82 = vrot.lane.b32.xlu1 %v68_v0, %s255_s2  ;;  %78 = vrot.lane.b32.xlu0 %v66_v1, %s255_s2  ;;  %v70_v2 = vld [vmem:[#allocation7] sm:$0xff]  ;;  %v69_v3 = vld [vmem:[#allocation5 + $0x18] sm:$0xff]  ;;  %v67_v4 = vld [vmem:[#allocation5 + $0x8] sm:$0xff]  ;;  %vm106_vm0 = vcmask 261120   ;;  %vm111_vm1 = vcmask 785408   ;;  %s257_s28 = smov [#allocation8]  }
  0x10   :  { %94 = vrot.lane.b32.xlu2 %v70_v2, %s256_s27  ;;  %v71_v5 = vld [vmem:[#allocation7 + $0x8] sm:$0xff]  ;;  %v73_v6 = vld [vmem:[#allocation7 + $0x18] sm:$0xff]  ;;  %v72_v7 = vld [vmem:[#allocation7 + $0x10] sm:$0xff]  ;;  %s124_s29 = sshll.u32 %s257_s28, 4  ;;  %s126_s5 = sshll.u32 %s313_s3, 4  ;;  %s125_s29 = int_to_ptr.vmem [resolvable:$true] %s124_s29  ;;  %s127_s5 = int_to_ptr.hbm [resolvable:$true] %s126_s5 }
  0x11   :  { %v62_v9 = vld [vmem:[#allocation2] sm:$0xff]  ;;  %v63_v14 = vld [vmem:[#allocation2 + $0x8] sm:$0xff]  ;;  %v64_v20 = vld [vmem:[#allocation2 + $0x10] sm:$0xff] }
  0x12   :  { %v65_v21 = vld [vmem:[#allocation2 + $0x18] sm:$0xff] }
  0x17   :  { %84 = vrot.lane.b32.xlu1 %v69_v3, %s255_s2  ;;  %80 = vrot.lane.b32.xlu0 %v67_v4, %s255_s2 }
  0x18   :  { %96 = vrot.lane.b32.xlu2 %v71_v5, %s256_s27 }
  0x1f   :  { %100 = vrot.lane.b32.xlu1 %v73_v6, %s256_s27  ;;  %98 = vrot.lane.b32.xlu0 %v72_v7, %s256_s27 }
  0x6a   :  { %v95_v8 = vpop.permute.xlu2 %94 }
  0x72   :  { %v97_v15 = vpop.permute.xlu2 %96 }
  0x81   :  { %v83_v10 = vpop.permute.xlu1 %82  ;;  %v79_v11 = vpop.permute.xlu0 %78 }
  0x82   :  { %v107_v12 = vsel %vm106_vm0, %v62_v9, %v79_v11  ;;  %v109_v22 = vsel %vm106_vm0, %v64_v20, %v83_v10 }
  0x83   :  { %v112_v13 = vsel %vm111_vm1, %v107_v12, %v95_v8 }
  0x84   :  { %116 = vst [vmem:[#allocation8] sm:$0xff] %v112_v13 }
  0x89   :  { %v85_v16 = vpop.permute.xlu1 %84  ;;  %v81_v17 = vpop.permute.xlu0 %80 }
  0x8a   :  { %v108_v18 = vsel %vm106_vm0, %v63_v14, %v81_v17  ;;  %v110_v23 = vsel %vm106_vm0, %v65_v21, %v85_v16 }
  0x8b   :  { %v113_v19 = vsel %vm111_vm1, %v108_v18, %v97_v15 }
  0x8c   :  { %117 = vst [vmem:[#allocation8 + $0x8] sm:$0xff] %v113_v19 }
  0x91   :  { %v101_v24 = vpop.permute.xlu1 %100  ;;  %v99_v25 = vpop.permute.xlu0 %98 }
  0x92   :  { %v115_v26 = vsel %vm111_vm1, %v110_v23, %v101_v24  ;;  %v114_v27 = vsel %vm111_vm1, %v109_v22, %v99_v25 }
  0x93   :  { %119 = vst [vmem:[#allocation8 + $0x18] sm:$0xff] %v115_v26 }
  0x94   :  { %118 = vst [vmem:[#allocation8 + $0x10] sm:$0xff] %v114_v27 }
  0x95   :  { %132 = dma.vmem_to_hbm [thread:$0]  %s125_s29, 512, %s127_s5, [#allocation4], %s251_s20, %s251_s20, %s252_s21  }
  0x96   :  { %248 = dma.done.wait [#allocation4], 512  }
  0x97   :  { %249 = vsyncadd [#allocation4], 4294966784 }
  0x98   :  { %137 = vsyncpa [#allocation3], 1 }
  0x99   :  { %138 = vsyncpa [#allocation6], 1 }
  0x9a   :  { %139 = vsyncpa [#allocation4], 1 }

</bundles_post_ra>
